<compile_context>
chip_gen: v5e
topology: v5e:2x2
jax: 0.10.0
libtpu: 0.0.40
codegen_flags: <defaults>
</compile_context>

<pallas_src>
import functools

import jax
import jax.numpy as jnp
import numpy as np
from jax.experimental import pallas as pl
from jax.experimental.pallas import tpu as pltpu


def _pick_batch_block(B, bytes_per_batch, budget_bytes=6 * 1024 * 1024, max_blk=16):
    """Largest divisor of B such that one seq tile stays within `budget_bytes`.

    The budget is conservative so (double-buffered tile + in-kernel intermediates)
    fits comfortably inside v7x's 64 MiB VMEM; on 128 MiB parts (v5e/v6e) it can be
    raised (e.g. 16-24 MiB) to amortize per-grid-step overhead further.
    """
    blk = max(1, min(B, max_blk, budget_bytes // max(bytes_per_batch, 1)))
    while B % blk:
        blk -= 1
    return blk


def _clamp_vmem(nbytes, lo=16 * 1024 * 1024, hi=40 * 1024 * 1024):
    # 40 MiB cap keeps headroom on v7x (64 MiB physical per TC).
    return int(min(max(nbytes, lo), hi))


# --------------------------- kernel 1: attention logits ---------------------------
def tatt1_logits_kernel(seq_ref, w1_ref, w2_ref, wT_ref, b_ref, v_ref,
                        logits_ref, stats_ref):
    Bblk, C, N, T = seq_ref.shape
    f32 = jnp.float32

    w2_col = w2_ref[...]                                     # (N, 1), sublane-major

    # One pass over the input tile, one channel slab at a time: each (Bblk, N, T)
    # slab is consumed for both the conv1 (f1) and conv2 (f2) reductions before the
    # next one is touched -> bounded vreg live-set, no full-tile materialization.
    x = seq_ref[:, 0]                                        # (Bblk, N, T)
    f1 = w1_ref[0] * x                                       # (Bblk, N, T)
    f2_cols = [jnp.sum(x * w2_col, axis=1, keepdims=True)]   # each (Bblk, 1, T)
    for c in range(1, C):
        x = seq_ref[:, c]
        f1 = f1 + w1_ref[c] * x
        f2_cols.append(jnp.sum(x * w2_col, axis=1, keepdims=True))

    # tmp[b,c,t] = sum_n w[n,c] * f1[b,n,t]: one batched MXU contraction over the
    # node axis in standard (b,m,k)x(b,k,n) form (w^T broadcast over the block).
    wT_b = jnp.broadcast_to(wT_ref[...][None], (Bblk, C, N))
    tmp_ct = jnp.einsum('bcn,bnt->bct', wT_b, f1,
                        preferred_element_type=f32)          # (Bblk, C, T)

    # s[b] = (f1[b]^T @ w) @ f2[b] + b as C rank-1 VPU updates (c_in is small):
    # avoids degenerate (T,C)@(C,T) MXU calls and any (C,T) transposes.
    s = tmp_ct[:, 0, :, None] * f2_cols[0] + b_ref[...][None, :, :]   # (Bblk, T, T)
    for c in range(1, C):
        s = s + tmp_ct[:, c, :, None] * f2_cols[c]

    sig = 0.5 * (jnp.tanh(0.5 * s) + 1.0)                    # numerically-safe sigmoid (EUP)

    # v-projection: one batched MXU call across the whole block.
    v_b = jnp.broadcast_to(v_ref[...][None], (Bblk, T, T))
    logits = jnp.einsum('bik,bkj->bij', v_b, sig,
                        preferred_element_type=f32)          # (Bblk, T, T)

    logits_ref[...] = logits                                 # one whole-block store

    # Per-block BatchNorm1d partial statistics, folded into the main pass: for each
    # output column t2, sum and sum-of-squares over (batch-in-block, t1).
    col_sum = jnp.sum(jnp.sum(logits, axis=0), axis=0, keepdims=True)           # (1, T)
    col_sq = jnp.sum(jnp.sum(logits * logits, axis=0), axis=0, keepdims=True)   # (1, T)
    stats_ref[0:1, 0:1, :] = col_sum[None]
    stats_ref[0:1, 1:2, :] = col_sq[None]


# ----------------------- kernel 2: BatchNorm1d + row softmax ----------------------
def tatt1_bn_softmax_kernel(stats_ref, gamma_ref, beta_ref, logits_ref, out_ref,
                            *, inv_count):
    # Global BN batch statistics from the per-block partial sums (tiny reduce,
    # recomputed per chunk so the batch axis stays fully parallel).
    totals = jnp.sum(stats_ref[...], axis=0)                 # (2, T)
    mean = totals[0:1, :] * inv_count                        # (1, T)
    var = totals[1:2, :] * inv_count - mean * mean           # biased var (training mode)
    inv_std = jax.lax.rsqrt(var + 1e-5)                      # (1, T)
    scale = (gamma_ref[...] * inv_std)[None, :, :]           # (1, 1, T)
    shift = (beta_ref[...] - gamma_ref[...] * inv_std * mean)[None, :, :]

    y = logits_ref[...] * scale + shift                      # (Bblk2, T, T)
    m = jnp.max(y, axis=-1, keepdims=True)
    e = jnp.exp(y - m)
    out_ref[...] = e / jnp.sum(e, axis=-1, keepdims=True)    # exact row softmax


# ----------------------------------- wrapper --------------------------------------
@jax.jit
def tatt1_forward(seq, w1, w2, w, bmat, v, gamma, beta):
    """TATT_1 forward. seq: (B, c_in, num_nodes, tem_size) float32, native layout."""
    B, C, N, T = seq.shape
    f32 = jnp.float32

    w1_vec = jnp.reshape(w1, (C,)).astype(f32)               # conv1 weights -> SMEM scalars
    w2_col = jnp.reshape(w2, (N, 1)).astype(f32)             # conv2 weights, sublane-major
    wT = jnp.transpose(jnp.reshape(w, (N, C)))                # (C, N): tiny param transpose only
    gamma_row = jnp.reshape(gamma, (1, T)).astype(f32)
    beta_row = jnp.reshape(beta, (1, T)).astype(f32)

    bblk = _pick_batch_block(B, C * N * T * 4)
    nblk = B // bblk

    # Kernel-1 VMEM: double-buffered seq tile + double-buffered outputs + params
    # + headroom for in-kernel intermediates (f1, s, logits, ...).
    in_tile = bblk * C * N * T * 4
    vmem1 = _clamp_vmem(2 * in_tile
                        + 6 * bblk * N * T * 4
                        + 8 * bblk * T * T * 4
                        + (C * N + N + 2 * T * T + 2 * T + C) * 4
                        + 2 * 1024 * 1024)

    logits, stats = pl.pallas_call(
        tatt1_logits_kernel,
        out_shape=(jax.ShapeDtypeStruct((B, T, T), f32),
                   jax.ShapeDtypeStruct((nblk, 2, T), f32)),
        grid=(nblk,),
        in_specs=[
            pl.BlockSpec((bblk, C, N, T), lambda g: (g, 0, 0, 0)),     # seq (native layout)
            pl.BlockSpec(memory_space=pltpu.MemorySpace.SMEM),         # conv1 weights
            pl.BlockSpec((N, 1), lambda g: (0, 0)),                    # conv2 weights
            pl.BlockSpec((C, N), lambda g: (0, 0)),                    # w^T
            pl.BlockSpec((T, T), lambda g: (0, 0)),                    # b
            pl.BlockSpec((T, T), lambda g: (0, 0)),                    # v
        ],
        out_specs=(pl.BlockSpec((bblk, T, T), lambda g: (g, 0, 0)),    # logits
                   pl.BlockSpec((1, 2, T), lambda g: (g, 0, 0))),      # BN partial stats
        compiler_params=pltpu.CompilerParams(
            dimension_semantics=("parallel",),   # batch blocks are fully independent
            vmem_limit_bytes=vmem1),
    )(seq, w1_vec, w2_col, wT, bmat, v)

    # Second (tiny) pass: BN normalize + softmax, chunked over batch, fully parallel.
    bblk2 = max(1, min(B, max(1, (256 * 1024) // max(T * T * 4, 1))))
    while B % bblk2:
        bblk2 -= 1
    vmem2 = _clamp_vmem(4 * bblk2 * T * T * 4
                        + (nblk * 2 * T + 6 * T) * 4
                        + 2 * 1024 * 1024)

    out = pl.pallas_call(
        functools.partial(tatt1_bn_softmax_kernel, inv_count=1.0 / float(B * T)),
        out_shape=jax.ShapeDtypeStruct((B, T, T), f32),
        grid=(B // bblk2,),
        in_specs=[
            pl.BlockSpec((nblk, 2, T), lambda g: (0, 0, 0)),           # BN partials (all)
            pl.BlockSpec((1, T), lambda g: (0, 0)),                    # gamma
            pl.BlockSpec((1, T), lambda g: (0, 0)),                    # beta
            pl.BlockSpec((bblk2, T, T), lambda g: (g, 0, 0)),          # logits chunk
        ],
        out_specs=pl.BlockSpec((bblk2, T, T), lambda g: (g, 0, 0)),
        compiler_params=pltpu.CompilerParams(
            dimension_semantics=("parallel",),
            vmem_limit_bytes=vmem2),
    )(stats, gamma_row, beta_row, logits)

    return out


# ------------------------------ pure-JAX reference --------------------------------
def tatt1_reference(seq, w1, w2, w, bmat, v, gamma, beta):
    w1v = w1.reshape(-1)                                 # (C,)
    w2v = w2.reshape(-1)                                 # (N,)
    f1 = jnp.einsum('bcnt,c->btn', seq, w1v)             # (B, T, N)
    f2 = jnp.einsum('bcnt,n->bct', seq, w2v)             # (B, C, T)
    lg = jax.nn.sigmoid(
        jnp.einsum('btc,bcs->bts', jnp.einsum('btn,nc->btc', f1, w), f2) + bmat)
    lg = jnp.einsum('ts,bsu->btu', v, lg)                # (B, T, T)
    x = jnp.transpose(lg, (0, 2, 1))                     # (B, C=T, L=T)
    mean = jnp.mean(x, axis=(0, 2), keepdims=True)
    var = jnp.mean((x - mean) ** 2, axis=(0, 2), keepdims=True)
    xn = (x - mean) / jnp.sqrt(var + 1e-5) * gamma.reshape(1, -1, 1) + beta.reshape(1, -1, 1)
    lg = jnp.transpose(xn, (0, 2, 1))
    return jax.nn.softmax(lg, axis=-1)


if __name__ == "__main__":
    B, C, N, T = 2, 4, 16, 8   # batch, c_in, num_nodes, tem_size

    key = jax.random.PRNGKey(0)
    k1, k2, k3, k4, k5 = jax.random.split(key, 5)

    seq = jax.random.normal(k1, (B, C, N, T), dtype=jnp.float32)

    # conv1: Conv2d(c_in, 1, 1x1, bias=False) -> weight (C,); stored as (C, 1)
    b1 = 1.0 / np.sqrt(C)
    w1 = jax.random.uniform(k2, (C, 1), minval=-b1, maxval=b1, dtype=jnp.float32)
    # conv2: Conv2d(num_nodes, 1, 1x1, bias=False) -> weight (N,); stored as (1, N)
    b2 = 1.0 / np.sqrt(N)
    w2 = jax.random.uniform(k3, (1, N), minval=-b2, maxval=b2, dtype=jnp.float32)
    # w: xavier_uniform (num_nodes, c_in)
    aw = np.sqrt(6.0 / (N + C))
    w = jax.random.uniform(k4, (N, C), minval=-aw, maxval=aw, dtype=jnp.float32)
    # b: zeros (T, T); v: xavier_uniform (T, T)
    bmat = jnp.zeros((T, T), dtype=jnp.float32)
    av = np.sqrt(6.0 / (T + T))
    v = jax.random.uniform(k5, (T, T), minval=-av, maxval=av, dtype=jnp.float32)
    # BatchNorm1d(T) affine params (default init)
    gamma = jnp.ones((1, T), dtype=jnp.float32)
    beta = jnp.zeros((1, T), dtype=jnp.float32)

    out = tatt1_forward(seq, w1, w2, w, bmat, v, gamma, beta)
    out = jax.block_until_ready(out)

    ref = tatt1_reference(seq, w1, w2, w, bmat, v, gamma, beta)
    np.testing.assert_allclose(np.asarray(out), np.asarray(ref), rtol=2e-3, atol=2e-3)

    print("KERNEL_OK")
</pallas_src>

<mosaic_0001>
module attributes {stable_mosaic.version = 11 : i64} {
  func.func @tatt1_bn_softmax_kernel(%arg0: i32, %arg1: memref<1x2x8xf32, #tpu.memory_space<vmem>>, %arg2: memref<1x8xf32, #tpu.memory_space<vmem>>, %arg3: memref<1x8xf32, #tpu.memory_space<vmem>>, %arg4: memref<2x8x8xf32, #tpu.memory_space<vmem>>, %arg5: memref<2x8x8xf32, #tpu.memory_space<vmem>>) attributes {dimension_semantics = [#tpu.dimension_semantics<parallel>], iteration_bounds = array<i64: 1>, scalar_prefetch = 0 : i64, scratch_operands = 0 : i64, tpu.core_type = #tpu.core_type<tc>, window_params = [{pipeline_mode = #tpu.pipeline_mode<synchronous>, transform_indices = @transform_0, window_bounds = array<i64: 1, 2, 8>}, {pipeline_mode = #tpu.pipeline_mode<synchronous>, transform_indices = @transform_1, window_bounds = array<i64: 1, 8>}, {pipeline_mode = #tpu.pipeline_mode<synchronous>, transform_indices = @transform_2, window_bounds = array<i64: 1, 8>}, {transform_indices = @transform_3, window_bounds = array<i64: 2, 8, 8>}, {transform_indices = @transform_4, window_bounds = array<i64: 2, 8, 8>}]} {
    %c0 = arith.constant 0 : index
    %c0_0 = arith.constant 0 : index
    %c0_1 = arith.constant 0 : index
    %0 = vector.load %arg1[%c0, %c0_0, %c0_1] : memref<1x2x8xf32, #tpu.memory_space<vmem>>, vector<1x2x8xf32>
    %cst = arith.constant dense<0.000000e+00> : vector<2x8xf32>
    %1 = vector.multi_reduction <add>, %0, %cst [0] : vector<1x2x8xf32> to vector<2x8xf32>
    %2 = vector.extract_strided_slice %1 {offsets = [0, 0], sizes = [1, 8], strides = [1, 1]} : vector<2x8xf32> to vector<1x8xf32>
    %cst_2 = arith.constant 6.250000e-02 : f32
    %3 = vector.broadcast %cst_2 : f32 to vector<1x8xf32>
    %4 = arith.mulf %2, %3 : vector<1x8xf32>
    %5 = vector.extract_strided_slice %1 {offsets = [1, 0], sizes = [1, 8], strides = [1, 1]} : vector<2x8xf32> to vector<1x8xf32>
    %cst_3 = arith.constant 6.250000e-02 : f32
    %6 = vector.broadcast %cst_3 : f32 to vector<1x8xf32>
    %7 = arith.mulf %5, %6 : vector<1x8xf32>
    %8 = arith.mulf %4, %4 : vector<1x8xf32>
    %9 = arith.subf %7, %8 : vector<1x8xf32>
    %cst_4 = arith.constant 9.99999974E-6 : f32
    %10 = vector.broadcast %cst_4 : f32 to vector<1x8xf32>
    %11 = arith.addf %9, %10 : vector<1x8xf32>
    %12 = math.rsqrt %11 : vector<1x8xf32>
    %c0_5 = arith.constant 0 : index
    %c0_6 = arith.constant 0 : index
    %13 = vector.load %arg2[%c0_5, %c0_6] : memref<1x8xf32, #tpu.memory_space<vmem>>, vector<1x8xf32>
    %14 = arith.mulf %13, %12 : vector<1x8xf32>
    %15 = vector.shape_cast %14 : vector<1x8xf32> to vector<1x1x8xf32>
    %c0_7 = arith.constant 0 : index
    %c0_8 = arith.constant 0 : index
    %16 = vector.load %arg3[%c0_7, %c0_8] : memref<1x8xf32, #tpu.memory_space<vmem>>, vector<1x8xf32>
    %c0_9 = arith.constant 0 : index
    %c0_10 = arith.constant 0 : index
    %17 = vector.load %arg2[%c0_9, %c0_10] : memref<1x8xf32, #tpu.memory_space<vmem>>, vector<1x8xf32>
    %18 = arith.mulf %17, %12 : vector<1x8xf32>
    %19 = arith.mulf %18, %4 : vector<1x8xf32>
    %20 = arith.subf %16, %19 : vector<1x8xf32>
    %21 = vector.shape_cast %20 : vector<1x8xf32> to vector<1x1x8xf32>
    %c0_11 = arith.constant 0 : index
    %c0_12 = arith.constant 0 : index
    %c0_13 = arith.constant 0 : index
    %22 = vector.load %arg4[%c0_11, %c0_12, %c0_13] : memref<2x8x8xf32, #tpu.memory_space<vmem>>, vector<2x8x8xf32>
    %23 = vector.broadcast %15 : vector<1x1x8xf32> to vector<2x8x8xf32>
    %24 = arith.mulf %22, %23 : vector<2x8x8xf32>
    %25 = vector.broadcast %21 : vector<1x1x8xf32> to vector<2x8x8xf32>
    %26 = arith.addf %24, %25 : vector<2x8x8xf32>
    %cst_14 = arith.constant dense<0xFF800000> : vector<2x8xf32>
    %27 = vector.multi_reduction <maximumf>, %26, %cst_14 [2] : vector<2x8x8xf32> to vector<2x8xf32>
    %28 = vector.shape_cast %27 : vector<2x8xf32> to vector<2x8x1xf32>
    %29 = vector.broadcast %28 : vector<2x8x1xf32> to vector<2x8x8xf32>
    %30 = arith.subf %26, %29 : vector<2x8x8xf32>
    %31 = math.exp %30 : vector<2x8x8xf32>
    %cst_15 = arith.constant dense<0.000000e+00> : vector<2x8xf32>
    %32 = vector.multi_reduction <add>, %31, %cst_15 [2] : vector<2x8x8xf32> to vector<2x8xf32>
    %33 = vector.shape_cast %32 : vector<2x8xf32> to vector<2x8x1xf32>
    %34 = vector.broadcast %33 : vector<2x8x1xf32> to vector<2x8x8xf32>
    %35 = arith.divf %31, %34 : vector<2x8x8xf32>
    %c0_16 = arith.constant 0 : index
    %c0_17 = arith.constant 0 : index
    %c0_18 = arith.constant 0 : index
    %36 = vector.load %arg5[%c0_16, %c0_17, %c0_18] : memref<2x8x8xf32, #tpu.memory_space<vmem>>, vector<2x8x8xf32>
    tpu.vector_store %arg5[%c0_16, %c0_17, %c0_18], %35 {strides = array<i32>} : memref<2x8x8xf32, #tpu.memory_space<vmem>>, vector<2x8x8xf32>,
    return
  }
  func.func @transform_0(%arg0: i32) -> (i32, i32, i32) {
    %c0_i32 = arith.constant 0 : i32
    %c0_i32_0 = arith.constant 0 : i32
    %c0_i32_1 = arith.constant 0 : i32
    %c0_i32_2 = arith.constant 0 : i32
    return %c0_i32, %c0_i32_0, %c0_i32_1 : i32, i32, i32
  }
  func.func @transform_1(%arg0: i32) -> (i32, i32) {
    %c0_i32 = arith.constant 0 : i32
    %c0_i32_0 = arith.constant 0 : i32
    %c0_i32_1 = arith.constant 0 : i32
    return %c0_i32, %c0_i32_0 : i32, i32
  }
  func.func @transform_2(%arg0: i32) -> (i32, i32) {
    %c0_i32 = arith.constant 0 : i32
    %c0_i32_0 = arith.constant 0 : i32
    %c0_i32_1 = arith.constant 0 : i32
    return %c0_i32, %c0_i32_0 : i32, i32
  }
  func.func @transform_3(%arg0: i32) -> (i32, i32, i32) {
    %c0_i32 = arith.constant 0 : i32
    %c0_i32_0 = arith.constant 0 : i32
    %c0_i32_1 = arith.constant 0 : i32
    return %arg0, %c0_i32, %c0_i32_0 : i32, i32, i32
  }
  func.func @transform_4(%arg0: i32) -> (i32, i32, i32) {
    %c0_i32 = arith.constant 0 : i32
    %c0_i32_0 = arith.constant 0 : i32
    %c0_i32_1 = arith.constant 0 : i32
    return %arg0, %c0_i32, %c0_i32_0 : i32, i32, i32
  }
}

module attributes {stable_mosaic.version = 11 : i64} {
  func.func @tatt1_logits_kernel(%arg0: i32, %arg1: memref<2x4x16x8xf32, #tpu.memory_space<vmem>>, %arg2: memref<4xf32, #tpu.memory_space<smem>>, %arg3: memref<16x1xf32, #tpu.memory_space<vmem>>, %arg4: memref<4x16xf32, #tpu.memory_space<vmem>>, %arg5: memref<8x8xf32, #tpu.memory_space<vmem>>, %arg6: memref<8x8xf32, #tpu.memory_space<vmem>>, %arg7: memref<2x8x8xf32, #tpu.memory_space<vmem>>, %arg8: memref<1x2x8xf32, #tpu.memory_space<vmem>>) attributes {dimension_semantics = [#tpu.dimension_semantics<parallel>], iteration_bounds = array<i64: 1>, scalar_prefetch = 0 : i64, scratch_operands = 0 : i64, tpu.core_type = #tpu.core_type<tc>, window_params = [{transform_indices = @transform_0, window_bounds = array<i64: 2, 4, 16, 8>}, {transform_indices = @transform_1, window_bounds = array<i64: 4>}, {pipeline_mode = #tpu.pipeline_mode<synchronous>, transform_indices = @transform_2, window_bounds = array<i64: 16, 1>}, {pipeline_mode = #tpu.pipeline_mode<synchronous>, transform_indices = @transform_3, window_bounds = array<i64: 4, 16>}, {pipeline_mode = #tpu.pipeline_mode<synchronous>, transform_indices = @transform_4, window_bounds = array<i64: 8, 8>}, {pipeline_mode = #tpu.pipeline_mode<synchronous>, transform_indices = @transform_5, window_bounds = array<i64: 8, 8>}, {transform_indices = @transform_6, window_bounds = array<i64: 2, 8, 8>}, {transform_indices = @transform_7, window_bounds = array<i64: 1, 2, 8>}]} {
    %c0 = arith.constant 0 : index
    %c0_0 = arith.constant 0 : index
    %0 = vector.load %arg3[%c0, %c0_0] : memref<16x1xf32, #tpu.memory_space<vmem>>, vector<16x1xf32>
    %c0_1 = arith.constant 0 : index
    %c0_2 = arith.constant 0 : index
    %c0_3 = arith.constant 0 : index
    %c0_4 = arith.constant 0 : index
    %1 = vector.load %arg1[%c0_1, %c0_2, %c0_3, %c0_4] : memref<2x4x16x8xf32, #tpu.memory_space<vmem>>, vector<2x1x16x8xf32>
    %2 = vector.shape_cast %1 : vector<2x1x16x8xf32> to vector<2x16x8xf32>
    %c0_5 = arith.constant 0 : index
    %3 = memref.load %arg2[%c0_5] : memref<4xf32, #tpu.memory_space<smem>>
    %4 = vector.broadcast %3 : f32 to vector<2x16x8xf32>
    %5 = arith.mulf %4, %2 : vector<2x16x8xf32>
    %6 = vector.shape_cast %0 : vector<16x1xf32> to vector<1x16x1xf32>
    %7 = vector.broadcast %6 : vector<1x16x1xf32> to vector<2x16x8xf32>
    %8 = arith.mulf %2, %7 : vector<2x16x8xf32>
    %cst = arith.constant dense<0.000000e+00> : vector<2x8xf32>
    %9 = vector.multi_reduction <add>, %8, %cst [1] : vector<2x16x8xf32> to vector<2x8xf32>
    %10 = vector.shape_cast %9 : vector<2x8xf32> to vector<2x1x8xf32>
    %c0_6 = arith.constant 0 : index
    %c1 = arith.constant 1 : index
    %c0_7 = arith.constant 0 : index
    %c0_8 = arith.constant 0 : index
    %11 = vector.load %arg1[%c0_6, %c1, %c0_7, %c0_8] : memref<2x4x16x8xf32, #tpu.memory_space<vmem>>, vector<2x1x16x8xf32>
    %12 = vector.shape_cast %11 : vector<2x1x16x8xf32> to vector<2x16x8xf32>
    %c1_9 = arith.constant 1 : index
    %13 = memref.load %arg2[%c1_9] : memref<4xf32, #tpu.memory_space<smem>>
    %14 = vector.broadcast %13 : f32 to vector<2x16x8xf32>
    %15 = arith.mulf %14, %12 : vector<2x16x8xf32>
    %16 = arith.addf %5, %15 : vector<2x16x8xf32>
    %17 = vector.shape_cast %0 : vector<16x1xf32> to vector<1x16x1xf32>
    %18 = vector.broadcast %17 : vector<1x16x1xf32> to vector<2x16x8xf32>
    %19 = arith.mulf %12, %18 : vector<2x16x8xf32>
    %cst_10 = arith.constant dense<0.000000e+00> : vector<2x8xf32>
    %20 = vector.multi_reduction <add>, %19, %cst_10 [1] : vector<2x16x8xf32> to vector<2x8xf32>
    %21 = vector.shape_cast %20 : vector<2x8xf32> to vector<2x1x8xf32>
    %c0_11 = arith.constant 0 : index
    %c2 = arith.constant 2 : index
    %c0_12 = arith.constant 0 : index
    %c0_13 = arith.constant 0 : index
    %22 = vector.load %arg1[%c0_11, %c2, %c0_12, %c0_13] : memref<2x4x16x8xf32, #tpu.memory_space<vmem>>, vector<2x1x16x8xf32>
    %23 = vector.shape_cast %22 : vector<2x1x16x8xf32> to vector<2x16x8xf32>
    %c2_14 = arith.constant 2 : index
    %24 = memref.load %arg2[%c2_14] : memref<4xf32, #tpu.memory_space<smem>>
    %25 = vector.broadcast %24 : f32 to vector<2x16x8xf32>
    %26 = arith.mulf %25, %23 : vector<2x16x8xf32>
    %27 = arith.addf %16, %26 : vector<2x16x8xf32>
    %28 = vector.shape_cast %0 : vector<16x1xf32> to vector<1x16x1xf32>
    %29 = vector.broadcast %28 : vector<1x16x1xf32> to vector<2x16x8xf32>
    %30 = arith.mulf %23, %29 : vector<2x16x8xf32>
    %cst_15 = arith.constant dense<0.000000e+00> : vector<2x8xf32>
    %31 = vector.multi_reduction <add>, %30, %cst_15 [1] : vector<2x16x8xf32> to vector<2x8xf32>
    %32 = vector.shape_cast %31 : vector<2x8xf32> to vector<2x1x8xf32>
    %c0_16 = arith.constant 0 : index
    %c3 = arith.constant 3 : index
    %c0_17 = arith.constant 0 : index
    %c0_18 = arith.constant 0 : index
    %33 = vector.load %arg1[%c0_16, %c3, %c0_17, %c0_18] : memref<2x4x16x8xf32, #tpu.memory_space<vmem>>, vector<2x1x16x8xf32>
    %34 = vector.shape_cast %33 : vector<2x1x16x8xf32> to vector<2x16x8xf32>
    %c3_19 = arith.constant 3 : index
    %35 = memref.load %arg2[%c3_19] : memref<4xf32, #tpu.memory_space<smem>>
    %36 = vector.broadcast %35 : f32 to vector<2x16x8xf32>
    %37 = arith.mulf %36, %34 : vector<2x16x8xf32>
    %38 = arith.addf %27, %37 : vector<2x16x8xf32>
    %39 = vector.shape_cast %0 : vector<16x1xf32> to vector<1x16x1xf32>
    %40 = vector.broadcast %39 : vector<1x16x1xf32> to vector<2x16x8xf32>
    %41 = arith.mulf %34, %40 : vector<2x16x8xf32>
    %cst_20 = arith.constant dense<0.000000e+00> : vector<2x8xf32>
    %42 = vector.multi_reduction <add>, %41, %cst_20 [1] : vector<2x16x8xf32> to vector<2x8xf32>
    %43 = vector.shape_cast %42 : vector<2x8xf32> to vector<2x1x8xf32>
    %c0_21 = arith.constant 0 : index
    %c0_22 = arith.constant 0 : index
    %44 = vector.load %arg4[%c0_21, %c0_22] : memref<4x16xf32, #tpu.memory_space<vmem>>, vector<4x16xf32>
    %45 = vector.shape_cast %44 : vector<4x16xf32> to vector<1x4x16xf32>
    %46 = vector.shape_cast %45 : vector<1x4x16xf32> to vector<1x4x16xf32>
    %47 = vector.broadcast %46 : vector<1x4x16xf32> to vector<2x4x16xf32>
    "tpu.trace_start"() <{level = 10 : i32, message = "bcn,bnt->bct"}> : () -> ()
    %cst_23 = arith.constant dense<0.000000e+00> : vector<2x4x8xf32>
    %48 = tpu.matmul %47, %38, %cst_23 {dimension_numbers = #tpu.dot_dimension_numbers<[2], [1], [1], [2], [0, 0, 0, 1, 1, 2], [0], [0]>} : vector<2x4x16xf32>, vector<2x16x8xf32>, vector<2x4x8xf32> -> vector<2x4x8xf32>
    "tpu.trace_stop"() : () -> ()
    %49 = vector.extract_strided_slice %48 {offsets = [0, 0, 0], sizes = [2, 1, 8], strides = [1, 1, 1]} : vector<2x4x8xf32> to vector<2x1x8xf32>
    %50 = vector.shape_cast %49 : vector<2x1x8xf32> to vector<2x8xf32>
    %51 = vector.shape_cast %50 : vector<2x8xf32> to vector<2x8x1xf32>
    %52 = vector.broadcast %51 : vector<2x8x1xf32> to vector<2x8x8xf32>
    %53 = vector.broadcast %10 : vector<2x1x8xf32> to vector<2x8x8xf32>
    %54 = arith.mulf %52, %53 : vector<2x8x8xf32>
    %c0_24 = arith.constant 0 : index
    %c0_25 = arith.constant 0 : index
    %55 = vector.load %arg5[%c0_24, %c0_25] : memref<8x8xf32, #tpu.memory_space<vmem>>, vector<8x8xf32>
    %56 = vector.shape_cast %55 : vector<8x8xf32> to vector<1x8x8xf32>
    %57 = vector.broadcast %56 : vector<1x8x8xf32> to vector<2x8x8xf32>
    %58 = arith.addf %54, %57 : vector<2x8x8xf32>
    %59 = vector.extract_strided_slice %48 {offsets = [0, 1, 0], sizes = [2, 1, 8], strides = [1, 1, 1]} : vector<2x4x8xf32> to vector<2x1x8xf32>
    %60 = vector.shape_cast %59 : vector<2x1x8xf32> to vector<2x8xf32>
    %61 = vector.shape_cast %60 : vector<2x8xf32> to vector<2x8x1xf32>
    %62 = vector.broadcast %61 : vector<2x8x1xf32> to vector<2x8x8xf32>
    %63 = vector.broadcast %21 : vector<2x1x8xf32> to vector<2x8x8xf32>
    %64 = arith.mulf %62, %63 : vector<2x8x8xf32>
    %65 = arith.addf %58, %64 : vector<2x8x8xf32>
    %66 = vector.extract_strided_slice %48 {offsets = [0, 2, 0], sizes = [2, 1, 8], strides = [1, 1, 1]} : vector<2x4x8xf32> to vector<2x1x8xf32>
    %67 = vector.shape_cast %66 : vector<2x1x8xf32> to vector<2x8xf32>
    %68 = vector.shape_cast %67 : vector<2x8xf32> to vector<2x8x1xf32>
    %69 = vector.broadcast %68 : vector<2x8x1xf32> to vector<2x8x8xf32>
    %70 = vector.broadcast %32 : vector<2x1x8xf32> to vector<2x8x8xf32>
    %71 = arith.mulf %69, %70 : vector<2x8x8xf32>
    %72 = arith.addf %65, %71 : vector<2x8x8xf32>
    %73 = vector.extract_strided_slice %48 {offsets = [0, 3, 0], sizes = [2, 1, 8], strides = [1, 1, 1]} : vector<2x4x8xf32> to vector<2x1x8xf32>
    %74 = vector.shape_cast %73 : vector<2x1x8xf32> to vector<2x8xf32>
    %75 = vector.shape_cast %74 : vector<2x8xf32> to vector<2x8x1xf32>
    %76 = vector.broadcast %75 : vector<2x8x1xf32> to vector<2x8x8xf32>
    %77 = vector.broadcast %43 : vector<2x1x8xf32> to vector<2x8x8xf32>
    %78 = arith.mulf %76, %77 : vector<2x8x8xf32>
    %79 = arith.addf %72, %78 : vector<2x8x8xf32>
    %cst_26 = arith.constant 5.000000e-01 : f32
    %80 = vector.broadcast %cst_26 : f32 to vector<2x8x8xf32>
    %81 = arith.mulf %80, %79 : vector<2x8x8xf32>
    %82 = math.tanh %81 : vector<2x8x8xf32>
    %cst_27 = arith.constant 1.000000e+00 : f32
    %83 = vector.broadcast %cst_27 : f32 to vector<2x8x8xf32>
    %84 = arith.addf %82, %83 : vector<2x8x8xf32>
    %cst_28 = arith.constant 5.000000e-01 : f32
    %85 = vector.broadcast %cst_28 : f32 to vector<2x8x8xf32>
    %86 = arith.mulf %85, %84 : vector<2x8x8xf32>
    %c0_29 = arith.constant 0 : index
    %c0_30 = arith.constant 0 : index
    %87 = vector.load %arg6[%c0_29, %c0_30] : memref<8x8xf32, #tpu.memory_space<vmem>>, vector<8x8xf32>
    %88 = vector.shape_cast %87 : vector<8x8xf32> to vector<1x8x8xf32>
    %89 = vector.shape_cast %88 : vector<1x8x8xf32> to vector<1x8x8xf32>
    %90 = vector.broadcast %89 : vector<1x8x8xf32> to vector<2x8x8xf32>
    "tpu.trace_start"() <{level = 10 : i32, message = "bik,bkj->bij"}> : () -> ()
    %cst_31 = arith.constant dense<0.000000e+00> : vector<2x8x8xf32>
    %91 = tpu.matmul %90, %86, %cst_31 {dimension_numbers = #tpu.dot_dimension_numbers<[2], [1], [1], [2], [0, 0, 0, 1, 1, 2], [0], [0]>} : vector<2x8x8xf32>, vector<2x8x8xf32>, vector<2x8x8xf32> -> vector<2x8x8xf32>
    "tpu.trace_stop"() : () -> ()
    %c0_32 = arith.constant 0 : index
    %c0_33 = arith.constant 0 : index
    %c0_34 = arith.constant 0 : index
    %92 = vector.load %arg7[%c0_32, %c0_33, %c0_34] : memref<2x8x8xf32, #tpu.memory_space<vmem>>, vector<2x8x8xf32>
    tpu.vector_store %arg7[%c0_32, %c0_33, %c0_34], %91 {strides = array<i32>} : memref<2x8x8xf32, #tpu.memory_space<vmem>>, vector<2x8x8xf32>,
    %cst_35 = arith.constant dense<0.000000e+00> : vector<8x8xf32>
    %93 = vector.multi_reduction <add>, %91, %cst_35 [0] : vector<2x8x8xf32> to vector<8x8xf32>
    %cst_36 = arith.constant dense<0.000000e+00> : vector<8xf32>
    %94 = vector.multi_reduction <add>, %93, %cst_36 [0] : vector<8x8xf32> to vector<8xf32>
    %95 = vector.shape_cast %94 : vector<8xf32> to vector<1x8xf32>
    %96 = arith.mulf %91, %91 : vector<2x8x8xf32>
    %cst_37 = arith.constant dense<0.000000e+00> : vector<8x8xf32>
    %97 = vector.multi_reduction <add>, %96, %cst_37 [0] : vector<2x8x8xf32> to vector<8x8xf32>
    %cst_38 = arith.constant dense<0.000000e+00> : vector<8xf32>
    %98 = vector.multi_reduction <add>, %97, %cst_38 [0] : vector<8x8xf32> to vector<8xf32>
    %99 = vector.shape_cast %98 : vector<8xf32> to vector<1x8xf32>
    %100 = vector.shape_cast %95 : vector<1x8xf32> to vector<1x1x8xf32>
    %c0_39 = arith.constant 0 : index
    %c0_40 = arith.constant 0 : index
    %c0_41 = arith.constant 0 : index
    %101 = vector.load %arg8[%c0_39, %c0_40, %c0_41] : memref<1x2x8xf32, #tpu.memory_space<vmem>>, vector<1x1x8xf32>
    tpu.vector_store %arg8[%c0_39, %c0_40, %c0_41], %100 {strides = array<i32>} : memref<1x2x8xf32, #tpu.memory_space<vmem>>, vector<1x1x8xf32>,
    %102 = vector.shape_cast %99 : vector<1x8xf32> to vector<1x1x8xf32>
    %c0_42 = arith.constant 0 : index
    %c1_43 = arith.constant 1 : index
    %c0_44 = arith.constant 0 : index
    %103 = vector.load %arg8[%c0_42, %c1_43, %c0_44] : memref<1x2x8xf32, #tpu.memory_space<vmem>>, vector<1x1x8xf32>
    tpu.vector_store %arg8[%c0_42, %c1_43, %c0_44], %102 {strides = array<i32>} : memref<1x2x8xf32, #tpu.memory_space<vmem>>, vector<1x1x8xf32>,
    return
  }
  func.func @transform_0(%arg0: i32) -> (i32, i32, i32, i32) {
    %c0_i32 = arith.constant 0 : i32
    %c0_i32_0 = arith.constant 0 : i32
    %c0_i32_1 = arith.constant 0 : i32
    %c0_i32_2 = arith.constant 0 : i32
    return %arg0, %c0_i32, %c0_i32_0, %c0_i32_1 : i32, i32, i32, i32
  }
  func.func @transform_1(%arg0: i32) -> i32 {
    %c0_i32 = arith.constant 0 : i32
    %c0_i32_0 = arith.constant 0 : i32
    return %c0_i32 : i32
  }
  func.func @transform_2(%arg0: i32) -> (i32, i32) {
    %c0_i32 = arith.constant 0 : i32
    %c0_i32_0 = arith.constant 0 : i32
    %c0_i32_1 = arith.constant 0 : i32
    return %c0_i32, %c0_i32_0 : i32, i32
  }
  func.func @transform_3(%arg0: i32) -> (i32, i32) {
    %c0_i32 = arith.constant 0 : i32
    %c0_i32_0 = arith.constant 0 : i32
    %c0_i32_1 = arith.constant 0 : i32
    return %c0_i32, %c0_i32_0 : i32, i32
  }
  func.func @transform_4(%arg0: i32) -> (i32, i32) {
    %c0_i32 = arith.constant 0 : i32
    %c0_i32_0 = arith.constant 0 : i32
    %c0_i32_1 = arith.constant 0 : i32
    return %c0_i32, %c0_i32_0 : i32, i32
  }
  func.func @transform_5(%arg0: i32) -> (i32, i32) {
    %c0_i32 = arith.constant 0 : i32
    %c0_i32_0 = arith.constant 0 : i32
    %c0_i32_1 = arith.constant 0 : i32
    return %c0_i32, %c0_i32_0 : i32, i32
  }
  func.func @transform_6(%arg0: i32) -> (i32, i32, i32) {
    %c0_i32 = arith.constant 0 : i32
    %c0_i32_0 = arith.constant 0 : i32
    %c0_i32_1 = arith.constant 0 : i32
    return %arg0, %c0_i32, %c0_i32_0 : i32, i32, i32
  }
  func.func @transform_7(%arg0: i32) -> (i32, i32, i32) {
    %c0_i32 = arith.constant 0 : i32
    %c0_i32_0 = arith.constant 0 : i32
    %c0_i32_1 = arith.constant 0 : i32
    return %arg0, %c0_i32, %c0_i32_0 : i32, i32, i32
  }
}

</mosaic_0001>

<bundles_post_ra>
// kernel: tatt1_forward.3
= control target key start
LH: loop header
LB: loop body
LE: loop exit
PB: predicated region body
PF: predicated region fallthrough
CT: control target
= control target key end

     0   :  { %s219_s0 = inlined_call_operand.vmem [shape: f32[1,2,8], index: 0, kind: input, shape index: {}]   ;;  %s220_s1 = inlined_call_operand.vmem [shape: f32[1,8], index: 1, kind: input, shape index: {}]   ;;  %s221_s2 = inlined_call_operand.vmem [shape: f32[1,8], index: 2, kind: input, shape index: {}]   ;;  %s222_s3 = inlined_call_operand.vmem [shape: f32[2,8,8], index: 3, kind: input, shape index: {}]   ;;  %s223_s4 = inlined_call_operand.hbm [shape: f32[2,8,8], index: 4, kind: output, shape index: {}]  }
   0x1   :  { %v18_v0 = vld [vmem:[%s219_s0] sm:$0x3] }
   0x2   :  { %9 = vsyncpa [#allocation3], 0  ;;  %v20_v1 = vmul.f32 0.0625, %v18_v0  ;;  %v37_v13 = vld [vmem:[%s220_s1] sm:$0x1]  ;;  %v48_v22 = vld [vmem:[%s222_s3 + $0x8] sm:$0xff] }
   0x3   :  { %v44_v16 = vld [vmem:[%s221_s2] sm:$0x1]  ;;  %vm59_vm3 = vcmask 64512   ;;  %s167_s1 = smov [#allocation2]   ;;  %s116_s25 = sshll.u32 %s223_s4, 4  ;;  %s117_s25 = int_to_ptr.hbm [resolvable:$true] %s116_s25 }
   0x4   :  { %v21_v2 = vmul.f32 %v20_v1, %v20_v1  ;;  %v47_v17 = vld [vmem:[%s222_s3] sm:$0xff]  ;;  %s114_s2 = sshll.u32 %s167_s1, 4  ;;  %s168_s26 = smov 128   ;;  %s115_s2 = int_to_ptr.vmem [resolvable:$true] %s114_s2 }
   0x5   :  { %s169_s27 = smov 8  }
   0x6   :  { %v23_v3 = vrot.slane %v21_v2, 7 }
   0x8   :  { %v25_v4 = vsub.f32 %v20_v1, %v23_v3 }
   0xa   :  { %v26_v5 = vadd.f32 1e-05, %v25_v4 }
   0xc   :  { %131 = vrsqrt.f32 %v26_v5  ;;  %vm33_vm0 = vweird.f32 %v26_v5 }
  0x12   :  { %v132_v6 = vpop.eup %131 }
  0x13   :  { %v28_v7 = vmul.f32 %v132_v6, %v26_v5  ;;  %vm34_vm1 = vweird.f32 %v132_v6 }
  0x14   :  { %vm35_vm2 = vmor %vm33_vm0, %vm34_vm1 }
  0x15   :  { %v29_v8 = vmul.f32 %v132_v6, %v28_v7 }
  0x17   :  { %v30_v9 = vmul.f32 0.5, %v29_v8 }
  0x19   :  { %v31_v10 = vsub.f32 1.5, %v30_v9 }
  0x1b   :  { %v32_v11 = vmul.f32 %v132_v6, %v31_v10 }
  0x1d   :  { %v36_v12 = vsel %vm35_vm2, %v132_v6, %v32_v11 }
  0x1e   :  { %39 = vst [vmem:[#allocation1] sm:$0xff] %v36_v12 }
  0x25   :  { %v41_v14 = vld [vmem:[#allocation1 + $0x1] ss:$9 sm:$0xff] }
  0x26   :  { %v43_v15 = vmul.f32 %v41_v14, %v37_v13 }
  0x28   :  { %v45_v18 = vmul.f32 %v43_v15, %v20_v1  ;;  %v50_v19 = vperm.slane %v43_v15, 0 }
  0x2a   :  { %v46_v20 = vsub.f32 %v44_v16, %v45_v18  ;;  %v52_v21 = vmul.f32 %v50_v19, %v47_v17  ;;  %v53_v25 = vmul.f32 %v50_v19, %v48_v22 }
  0x2c   :  { %v55_v23 = vperm.slane %v46_v20, 0 }
  0x2e   :  { %v57_v24 = vadd.f32 %v55_v23, %v52_v21  ;;  %v58_v27 = vadd.f32 %v55_v23, %v53_v25 }
  0x30   :  { %v60_v26 = vsel %vm59_vm3, %v57_v24, -inf  ;;  %v63_v28 = vsel %vm59_vm3, %v58_v27, -inf }
  0x31   :  { %61 = vmax.xlane.f32.xlu0 %v60_v26 }
  0x39   :  { %64 = vmax.xlane.f32.xlu0 %v63_v28 }
  0xa4   :  { %v62_v29 = vpop.xlane.xlu0 %61 }
  0xa5   :  { %v66_v30 = vsub.f32 %v57_v24, %v62_v29 }
  0xa7   :  { %v68_v31 = vmul.f32 1.442695, %v66_v30 }
  0xa9   :  { %133 = vpow2.f32 %v68_v31 }
  0xac   :  { %v65_v32 = vpop.xlane.xlu0 %64 }
  0xad   :  { %v67_v33 = vsub.f32 %v58_v27, %v65_v32 }
  0xaf   :  { %v134_v34 = vpop.eup %133  ;;  %v70_v35 = vmul.f32 1.442695, %v67_v33 }
  0xb0   :  { %v72_v36 = vsel %vm59_vm3, %v134_v34, 0.0 }
  0xb1   :  { %135 = vpow2.f32 %v70_v35  ;;  %73 = vadd.xlane.f32.xlu1 %v72_v36 }
  0xb7   :  { %v136_v37 = vpop.eup %135 }
  0xb8   :  { %v75_v38 = vsel %vm59_vm3, %v136_v37, 0.0 }
  0xb9   :  { %76 = vadd.xlane.f32.xlu1 %v75_v38 }
 0x124   :  { %v74_v39 = vpop.xlane.xlu1 %73 }
 0x125   :  { %137 = vrcp.f32 %v74_v39  ;;  %v89_v44 = vand.u32 2147483648, %v74_v39  ;;  %v87_v46 = vand.u32 2147483647, %v74_v39  ;;  %vm83_vm5 = vweird.f32 %v74_v39 }
 0x127   :  { %v90_v49 = vor.u32 1.1754944e-38, %v89_v44  ;;  %vm88_vm7 = vcmp.eq.f32.partialorder %v87_v46, 8.507059e+37 }
 0x12b   :  { %v138_v40 = vpop.eup %137 }
 0x12c   :  { %v79_v41 = vmul.f32 %v138_v40, %v74_v39  ;;  %v77_v42 = vpop.xlane.xlu1 %76  ;;  %vm84_vm4 = vweird.f32 %v138_v40 }
 0x12d   :  { %139 = vrcp.f32 %v77_v42  ;;  %vm85_vm6 = vmor %vm83_vm5, %vm84_vm4  ;;  %v104_v55 = vand.u32 2147483648, %v77_v42  ;;  %v102_v57 = vand.u32 2147483647, %v77_v42  ;;  %vm98_vm9 = vweird.f32 %v77_v42 }
 0x12e   :  { %v80_v43 = vsub.f32 1.0, %v79_v41 }
 0x12f   :  { %v105_v59 = vor.u32 1.1754944e-38, %v104_v55  ;;  %vm103_vm11 = vcmp.eq.f32.partialorder %v102_v57, 8.507059e+37 }
 0x130   :  { %v81_v45 = vmul.f32 %v138_v40, %v80_v43 }
 0x132   :  { %v82_v47 = vadd.f32 %v138_v40, %v81_v45 }
 0x133   :  { %v140_v48 = vpop.eup %139 }
 0x134   :  { %v86_v50 = vsel %vm85_vm6, %v138_v40, %v82_v47  ;;  %v94_v51 = vmul.f32 %v140_v48, %v77_v42  ;;  %vm99_vm8 = vweird.f32 %v140_v48 }
 0x135   :  { %v91_v52 = vsel %vm88_vm7, %v90_v49, %v86_v50  ;;  %vm100_vm10 = vmor %vm98_vm9, %vm99_vm8 }
 0x136   :  { %v92_v53 = vmul.f32 %v134_v34, %v91_v52  ;;  %v95_v54 = vsub.f32 1.0, %v94_v51 }
 0x138   :  { %108 = vst.msk [vmem:[#allocation2] sm:$0xff] %vm59_vm3, %v92_v53  ;;  %v96_v56 = vmul.f32 %v140_v48, %v95_v54 }
 0x13a   :  { %v97_v58 = vadd.f32 %v140_v48, %v96_v56 }
 0x13c   :  { %v101_v60 = vsel %vm100_vm10, %v140_v48, %v97_v58 }
 0x13d   :  { %v106_v61 = vsel %vm103_vm11, %v105_v59, %v101_v60 }
 0x13e   :  { %v107_v62 = vmul.f32 %v136_v37, %v106_v61 }
 0x140   :  { %109 = vst.msk [vmem:[#allocation2 + $0x8] sm:$0xff] %vm59_vm3, %v107_v62 }
 0x141   :  { %122 = dma.vmem_to_hbm [thread:$0]  %s115_s2, 256, %s117_s25, [#allocation3], %s168_s26, %s168_s26, %s169_s27  }
 0x142   :  { %165 = dma.done.wait [#allocation3], 256  }
 0x143   :  { %166 = vsyncadd [#allocation3], 4294967040 }
 0x144   :  { %127 = vsyncpa [#allocation3], 1 }

// kernel: tatt1_forward.2
= control target key start
LH: loop header
LB: loop body
LE: loop exit
PB: predicated region body
PF: predicated region fallthrough
CT: control target
= control target key end

     0   :  { %13 = vsyncpa [#allocation3], 0  ;;  %s443_s27 = smov [#allocation2]   ;;  %s653_s0 = inlined_call_operand.vmem [shape: f32[2,4,16,8], index: 0, kind: input, shape index: {}]   ;;  %s654_s1 = inlined_call_operand.vmem [shape: f32[4], index: 1, kind: input, shape index: {}]   ;;  %s655_s2 = inlined_call_operand.vmem [shape: f32[16,1], index: 2, kind: input, shape index: {}]   ;;  %s656_s3 = inlined_call_operand.vmem [shape: f32[4,16], index: 3, kind: input, shape index: {}]   ;;  %s657_s4 = inlined_call_operand.vmem [shape: f32[8,8], index: 4, kind: input, shape index: {}]   ;;  %s658_s5 = inlined_call_operand.vmem [shape: f32[8,8], index: 5, kind: input, shape index: {}]   ;;  %s659_s6 = inlined_call_operand.vmem [shape: f32[2,8,8], index: 6, kind: output, shape index: {0}]   ;;  %s660_s7 = inlined_call_operand.vmem [shape: f32[1,2,8], index: 7, kind: output, shape index: {1}]  }
   0x1   :  { %s21_s26 = sshll.u32 %s654_s1, 4  ;;  %s22_s26 = int_to_ptr.vmem [resolvable:$true] %s21_s26 }
   0x2   :  { %24 = dma.vmem_to_smem %s22_s26, 16, %s443_s27, [#allocation3]  }
   0x3   :  { %441 = dma.done.wait [#allocation3], 16  }
   0x4   :  { %442 = vsyncadd [#allocation3], 4294967280 }
   0x5   :  { %37 = sfence }
   0x6   :  { %s44_s28 = sld [smem:[#allocation2]]  ;;  %v240_v0 = vlaneseq  ;;  %v444_v1 = vmov 0   ;;  %v491_v2 = vld [vmem:[%s653_s0 + $0x8] sm:$0xff]  ;;  %v496_v4 = vld [vmem:[%s653_s0 + $0x18] sm:$0xff]  ;;  %v501_v5 = vld [vmem:[%s653_s0] sm:$0xff]  ;;  %vm195_vm0 = vcmask 130048  }
   0x7   :  { %s404_s29 = sld [smem:[#allocation2 + $0x1]]  ;;  %421 = vset.pattern.permute.xlu0 %v444_v1  ;;  %v506_v6 = vld [vmem:[%s653_s0 + $0x48] sm:$0xff]  ;;  %v511_v7 = vld [vmem:[%s653_s0 + $0x10] sm:$0xff]  ;;  %v516_v8 = vld [vmem:[%s653_s0 + $0x58] sm:$0xff]  ;;  %vm64_vm1 = vcmask 64512   ;;  %vm388_vm2 = vcmask 57344  }
   0x8   :  { %s409_s30 = sld [smem:[#allocation2 + $0x2]]  ;;  %v241_v3 = vshrl.u32 %v240_v0, 7  ;;  %v38_v9 = vld [vmem:[%s655_s2] sm:$0xff]  ;;  %v524_v11 = vld [vmem:[%s653_s0 + $0x28] sm:$0xff]  ;;  %v540_v16 = vld [vmem:[%s653_s0 + $0x38] sm:$0xff] }
   0x9   :  { %s414_s10 = sld [smem:[#allocation2 + $0x3]]  ;;  %v529_v12 = vld [vmem:[%s653_s0 + $0x20] sm:$0xff]  ;;  %v534_v13 = vld [vmem:[%s653_s0 + $0x68] sm:$0xff]  ;;  %52 = vperm.xlu0 %421, %v38_v9   ;;  %v546_v18 = vld [vmem:[%s653_s0 + $0x30] sm:$0xff] }
   0xa   :  { %423 = vset.pattern.permute.xlu2 %v241_v3  ;;  %422 = vset.pattern.permute.xlu1 %v241_v3  ;;  %v555_v24 = vld [vmem:[%s653_s0 + $0x78] sm:$0xff]  ;;  %v560_v25 = vld [vmem:[%s653_s0 + $0x40] sm:$0xff]  ;;  %v565_v26 = vld [vmem:[%s653_s0 + $0x50] sm:$0xff] }
   0xb   :  { %v573_v31 = vld [vmem:[%s653_s0 + $0x60] sm:$0xff]  ;;  %v580_v36 = vld [vmem:[%s653_s0 + $0x70] sm:$0xff]  ;;  %v39_v41 = vld [vmem:[%s655_s2 + $0x8] sm:$0xff] }
   0xc   :  { %v45_v10 = vstv %s44_s28  ;;  %v194_v52 = vld [vmem:[%s656_s3] sm:$0xf] }
   0xd   :  { %v47_v14 = vmul.f32 %v45_v10, %v491_v2  ;;  %v89_v15 = vstv %s404_s29  ;;  %v46_v17 = vmul.f32 %v45_v10, %v501_v5  ;;  %v49_v19 = vmul.f32 %v45_v10, %v506_v6 }
   0xe   :  { %v91_v20 = vmul.f32 %v496_v4, %v89_v15  ;;  %v126_v21 = vstv %s409_s30  ;;  %v90_v22 = vmul.f32 %v511_v7, %v89_v15  ;;  %v93_v23 = vmul.f32 %v516_v8, %v89_v15 }
   0xf   :  { %v128_v27 = vmul.f32 %v524_v11, %v126_v21  ;;  %v163_v28 = vstv %s414_s10  ;;  %v127_v29 = vmul.f32 %v529_v12, %v126_v21  ;;  %v130_v30 = vmul.f32 %v534_v13, %v126_v21 }
  0x10   :  { %v95_v32 = vadd.f32 %v91_v20, %v47_v14  ;;  %v165_v33 = vmul.f32 %v540_v16, %v163_v28  ;;  %v94_v34 = vadd.f32 %v90_v22, %v46_v17  ;;  %v164_v35 = vmul.f32 %v546_v18, %v163_v28 }
  0x11   :  { %v97_v37 = vadd.f32 %v93_v23, %v49_v19  ;;  %v167_v38 = vmul.f32 %v555_v24, %v163_v28  ;;  %v48_v39 = vmul.f32 %v45_v10, %v560_v25  ;;  %v92_v40 = vmul.f32 %v565_v26, %v89_v15  ;;  %57 = vperm.xlu0 %421, %v39_v41  }
  0x12   :  { %v132_v42 = vadd.f32 %v128_v27, %v95_v32  ;;  %v131_v43 = vadd.f32 %v127_v29, %v94_v34  ;;  %v129_v44 = vmul.f32 %v573_v31, %v126_v21  ;;  %v166_v47 = vmul.f32 %v580_v36, %v163_v28 }
  0x13   :  { %v134_v45 = vadd.f32 %v130_v30, %v97_v37  ;;  %v96_v46 = vadd.f32 %v92_v40, %v48_v39 }
  0x14   :  { %v169_v48 = vadd.f32 %v165_v33, %v132_v42  ;;  %v168_v49 = vadd.f32 %v164_v35, %v131_v43 }
  0x15   :  { %v171_v50 = vadd.f32 %v167_v38, %v134_v45  ;;  %v133_v51 = vadd.f32 %v129_v44, %v96_v46 }
  0x16   :  { %213 = vmatpush.msra.mxu0 %v169_v48 }
  0x17   :  { %233 = vmatpush.msra.mxu1 %v171_v50  ;;  %v170_v53 = vadd.f32 %v166_v47, %v133_v51 }
  0x18   :  { %214 = vmatpush.msra.mxu0 %v168_v49 }
  0x19   :  { %415 = vmatmul.msk.f32.vlgmr.msra.gmra.mxu0 %vm195_vm0, %v194_v52  ;;  %234 = vmatpush.msra.mxu1 %v170_v53 }
  0x1a   :  { %416 = vmatmul.msk.f32.vlgmr.msra.gmra.mxu1 %vm195_vm0, %v194_v52  ;;  %424 = vset.pattern.permute.xlu0 %v241_v3 }
  0x7b   :  { %v53_v0 = vpop.permute.xlu0 %52 }
  0x7c   :  { %v60_v3 = vmul.f32 %v53_v0, %v501_v5  ;;  %v98_v10 = vmul.f32 %v511_v7, %v53_v0  ;;  %v135_v19 = vmul.f32 %v529_v12, %v53_v0  ;;  %v172_v21 = vmul.f32 %v546_v18, %v53_v0 }
  0x7d   :  { %v62_v34 = vmul.f32 %v53_v0, %v560_v25  ;;  %v100_v39 = vmul.f32 %v565_v26, %v53_v0  ;;  %v137_v47 = vmul.f32 %v573_v31, %v53_v0 }
  0x7e   :  { %v65_v15 = vsel %vm64_vm1, %v60_v3, 0.0  ;;  %v102_v5 = vsel %vm64_vm1, %v98_v10, 0.0  ;;  %v176_v28 = vsel %vm64_vm1, %v172_v21, 0.0 }
  0x7f   :  { %v74_v44 = vsel %vm64_vm1, %v62_v34, 0.0  ;;  %v111_v50 = vsel %vm64_vm1, %v100_v39, 0.0 }
  0x83   :  { %v58_v1 = vpop.permute.xlu0 %57 }
  0x84   :  { %v61_v9 = vmul.f32 %v58_v1, %v491_v2  ;;  %v99_v14 = vmul.f32 %v496_v4, %v58_v1  ;;  %v136_v20 = vmul.f32 %v524_v11, %v58_v1  ;;  %v173_v22 = vmul.f32 %v540_v16, %v58_v1 }
  0x85   :  { %v139_v4 = vsel %vm64_vm1, %v135_v19, 0.0  ;;  %v63_v35 = vmul.f32 %v58_v1, %v506_v6  ;;  %v101_v42 = vmul.f32 %v516_v8, %v58_v1  ;;  %v138_v25 = vmul.f32 %v534_v13, %v58_v1 }
  0x86   :  { %v66_v17 = vsel %vm64_vm1, %v61_v9, 0.0  ;;  %v103_v2 = vsel %vm64_vm1, %v99_v14, 0.0  ;;  %v140_v23 = vsel %vm64_vm1, %v136_v20, 0.0  ;;  %v177_v12 = vsel %vm64_vm1, %v173_v22, 0.0 }
  0x87   :  { %v67_v7 = vadd.f32 %v66_v17, %v65_v15  ;;  %v104_v27 = vadd.f32 %v103_v2, %v102_v5  ;;  %v141_v11 = vadd.f32 %v140_v23, %v139_v4  ;;  %v178_v30 = vadd.f32 %v177_v12, %v176_v28 }
  0x88   :  { %v75_v45 = vsel %vm64_vm1, %v63_v35, 0.0  ;;  %v112_v26 = vsel %vm64_vm1, %v101_v42, 0.0  ;;  %v148_v8 = vsel %vm64_vm1, %v137_v47, 0.0  ;;  %v149_v53 = vsel %vm64_vm1, %v138_v25, 0.0 }
  0x89   :  { %v68_v29 = vrot.slane %v67_v7, 4  ;;  %v105_v18 = vrot.slane %v104_v27, 4  ;;  %v142_v16 = vrot.slane %v141_v11, 4  ;;  %v179_v33 = vrot.slane %v178_v30, 4 }
  0x8a   :  { %v76_v49 = vadd.f32 %v75_v45, %v74_v44  ;;  %v113_v31 = vadd.f32 %v112_v26, %v111_v50 }
  0x8b   :  { %v69_v32 = vadd.f32 %v68_v29, %v67_v7  ;;  %v106_v37 = vadd.f32 %v105_v18, %v104_v27  ;;  %v143_v41 = vadd.f32 %v142_v16, %v141_v11  ;;  %v180_v43 = vadd.f32 %v179_v33, %v178_v30 }
  0x8c   :  { %v114_v3 = vrot.slane %v113_v31, 4 }
  0x8d   :  { %v70_v40 = vrot.slane %v69_v32, 2  ;;  %v107_v46 = vrot.slane %v106_v37, 2  ;;  %v144_v6 = vrot.slane %v143_v41, 2  ;;  %v181_v51 = vrot.slane %v180_v43, 2 }
  0x8e   :  { %v115_v19 = vadd.f32 %v114_v3, %v113_v31 }
  0x8f   :  { %v71_v48 = vadd.f32 %v70_v40, %v69_v32  ;;  %v108_v52 = vadd.f32 %v107_v46, %v106_v37  ;;  %v145_v13 = vadd.f32 %v144_v6, %v143_v41 }
  0x90   :  { %v116_v12 = vrot.slane %v115_v19, 2 }
  0x91   :  { %v146_v10 = vrot.slane %v145_v13, 1 }
  0x92   :  { %v117_v35 = vadd.f32 %v116_v12, %v115_v19 }
  0x93   :  { %v147_v21 = vadd.f32 %v146_v10, %v145_v13 }
  0x96   :  { %v216_v54 = vpop.f32.mrf.mxu0 }
  0x97   :  { %v276_v55 = vperm.slane %v216_v54, 2  ;;  %v258_v56 = vperm.slane %v216_v54, 1  ;;  %v239_v57 = vperm.slane %v216_v54, 0  ;;  %v236_v58 = vpop.f32.mrf.mxu1  ;;  %v294_v61 = vperm.slane %v216_v54, 3 }
  0x98   :  { %v246_v59 = vperm.slane %v236_v58, 0  ;;  %v265_v60 = vperm.slane %v236_v58, 1  ;;  %v283_v62 = vperm.slane %v236_v58, 2  ;;  %v301_v63 = vperm.slane %v236_v58, 3 }
  0x99   :  { %263 = vperm.xlu2 %423, %v258_v56   ;;  %244 = vperm.xlu1 %422, %v239_v57   ;;  %v174_v54 = vmul.f32 %v580_v36, %v53_v0  ;;  %v72_v56 = vrot.slane %v71_v48, 1  ;;  %v77_v57 = vrot.slane %v76_v49, 4 }
  0x9a   :  { %281 = vperm.xlu0 %424, %v276_v55   ;;  %v175_v55 = vmul.f32 %v555_v24, %v58_v1  ;;  %v255_v1 = vld [vmem:[%s657_s4] sm:$0xff] }
  0x9b   :  { %v73_v9 = vadd.f32 %v72_v56, %v71_v48  ;;  %v78_v14 = vadd.f32 %v77_v57, %v76_v49 }
  0x9d   :  { %v79_v22 = vrot.slane %v78_v14, 2 }
  0x9f   :  { %v80_v30 = vadd.f32 %v79_v22, %v78_v14 }
  0xa1   :  { %270 = vperm.xlu2 %423, %v265_v60   ;;  %251 = vperm.xlu1 %422, %v246_v59   ;;  %v182_v59 = vadd.f32 %v181_v51, %v180_v43  ;;  %v109_v60 = vrot.slane %v108_v52, 1  ;;  %v81_v37 = vrot.slane %v80_v30, 1 }
  0xa3   :  { %v183_v15 = vrot.slane %v182_v59, 1  ;;  %v110_v36 = vadd.f32 %v109_v60, %v108_v52  ;;  %v82_v43 = vadd.f32 %v81_v37, %v80_v30 }
  0xa5   :  { %v184_v5 = vadd.f32 %v183_v15, %v182_v59 }
  0xa9   :  { %299 = vperm.xlu2 %423, %v294_v61   ;;  %288 = vperm.xlu1 %422, %v283_v62   ;;  %v150_v61 = vadd.f32 %v149_v53, %v148_v8  ;;  %v185_v62 = vsel %vm64_vm1, %v174_v54, 0.0  ;;  %v320_v53 = vld [vmem:[%s658_s5] sm:$0xff] }
  0xab   :  { %v151_v0 = vrot.slane %v150_v61, 4 }
  0xad   :  { %v152_v23 = vadd.f32 %v151_v0, %v150_v61 }
  0xaf   :  { %v153_v16 = vrot.slane %v152_v23, 2 }
  0xb1   :  { %306 = vperm.xlu1 %422, %v301_v63   ;;  %v186_v63 = vsel %vm64_vm1, %v175_v55, 0.0  ;;  %v154_v40 = vadd.f32 %v153_v16, %v152_v23 }
  0xb2   :  { %v187_v24 = vadd.f32 %v186_v63, %v185_v62 }
  0xb3   :  { %v155_v45 = vrot.slane %v154_v40, 1 }
  0xb4   :  { %v188_v27 = vrot.slane %v187_v24, 4 }
  0xb5   :  { %v156_v49 = vadd.f32 %v155_v45, %v154_v40 }
  0xb6   :  { %v189_v33 = vadd.f32 %v188_v27, %v187_v24 }
  0xb8   :  { %v190_v41 = vrot.slane %v189_v33, 2 }
  0xba   :  { %v191_v46 = vadd.f32 %v190_v41, %v189_v33 }
  0xbc   :  { %v192_v50 = vrot.slane %v191_v46, 1 }
  0xbe   :  { %v193_v55 = vadd.f32 %v192_v50, %v191_v46 }
  0xf3   :  { %v264_v38 = vpop.permute.xlu2 %263 }
  0xf4   :  { %v272_v7 = vmul.f32 %v264_v38, %v110_v36  ;;  %v118_v38 = vrot.slane %v117_v35, 1 }
  0xf6   :  { %v119_v25 = vadd.f32 %v118_v38, %v117_v35 }
  0xfb   :  { %v271_v58 = vpop.permute.xlu2 %270 }
  0xfc   :  { %v273_v51 = vmul.f32 %v271_v58, %v119_v25 }
 0x103   :  { %v300_v28 = vpop.permute.xlu2 %299 }
 0x104   :  { %v308_v18 = vmul.f32 %v300_v28, %v184_v5 }
 0x10b   :  { %v245_v17 = vpop.permute.xlu1 %244 }
 0x10c   :  { %v253_v20 = vmul.f32 %v245_v17, %v73_v9  ;;  %v282_v2 = vpop.permute.xlu0 %281 }
 0x10d   :  { %v290_v11 = vmul.f32 %v282_v2, %v147_v21 }
 0x10e   :  { %v256_v4 = vadd.f32 %v255_v1, %v253_v20 }
 0x110   :  { %v274_v29 = vadd.f32 %v272_v7, %v256_v4 }
 0x112   :  { %v292_v32 = vadd.f32 %v290_v11, %v274_v29 }
 0x113   :  { %v252_v34 = vpop.permute.xlu1 %251 }
 0x114   :  { %v310_v39 = vadd.f32 %v308_v18, %v292_v32  ;;  %v254_v44 = vmul.f32 %v252_v34, %v82_v43 }
 0x116   :  { %v312_v42 = vmul.f32 0.5, %v310_v39  ;;  %v257_v6 = vadd.f32 %v255_v1, %v254_v44 }
 0x118   :  { %425 = vtanh.f32 %v312_v42  ;;  %v275_v54 = vadd.f32 %v273_v51, %v257_v6 }
 0x11b   :  { %v289_v47 = vpop.permute.xlu1 %288 }
 0x11c   :  { %v291_v52 = vmul.f32 %v289_v47, %v156_v49 }
 0x11e   :  { %v426_v48 = vpop.eup %425  ;;  %v293_v56 = vadd.f32 %v291_v52, %v275_v54 }
 0x11f   :  { %v316_v26 = vadd.f32 1.0, %v426_v48 }
 0x121   :  { %v318_v8 = vmul.f32 0.5, %v316_v26 }
 0x123   :  { %v307_v31 = vpop.permute.xlu1 %306  ;;  %339 = vmatpush.msra.mxu2 %v318_v8 }
 0x124   :  { %v309_v13 = vmul.f32 %v307_v31, %v193_v55  ;;  %417 = vmatmul.msk.f32.vlgmr.msra.gmra.mxu2 %vm64_vm1, %v320_v53 }
 0x126   :  { %v311_v57 = vadd.f32 %v309_v13, %v293_v56 }
 0x128   :  { %v313_v59 = vmul.f32 0.5, %v311_v57 }
 0x12a   :  { %427 = vtanh.f32 %v313_v59 }
 0x130   :  { %v428_v60 = vpop.eup %427 }
 0x131   :  { %v317_v61 = vadd.f32 1.0, %v428_v60 }
 0x133   :  { %v319_v58 = vmul.f32 0.5, %v317_v61 }
 0x135   :  { %359 = vmatpush.msra.mxu3 %v319_v58 }
 0x136   :  { %418 = vmatmul.msk.f32.vlgmr.msra.gmra.mxu3 %vm64_vm1, %v320_v53 }
 0x1a7   :  { %v341_v62 = vpop.f32.mrf.mxu2 }
 0x1a8   :  { %364 = vst.msk [vmem:[%s659_s6] sm:$0xff] %vm64_vm1, %v341_v62  ;;  %v376_v63 = vmul.f32 %v341_v62, %v341_v62  ;;  %v366_v3 = vsel %vm64_vm1, %v341_v62, 0.0 }
 0x1aa   :  { %v378_v10 = vsel %vm64_vm1, %v376_v63, 0.0 }
 0x1b9   :  { %v361_v9 = vpop.f32.mrf.mxu3 }
 0x1ba   :  { %365 = vst.msk [vmem:[%s659_s6 + $0x8] sm:$0xff] %vm64_vm1, %v361_v9  ;;  %v367_v14 = vsel %vm64_vm1, %v361_v9, 0.0  ;;  %v377_v15 = vmul.f32 %v361_v9, %v361_v9 }
 0x1bb   :  { %v368_v36 = vadd.f32 %v367_v14, %v366_v3 }
 0x1bc   :  { %v379_v0 = vsel %vm64_vm1, %v377_v15, 0.0 }
 0x1bd   :  { %v369_v24 = vsel %vm64_vm1, %v368_v36, 0.0  ;;  %v380_v1 = vadd.f32 %v379_v0, %v378_v10 }
 0x1be   :  { %v370_v17 = vrot.slane %v369_v24, 4 }
 0x1bf   :  { %v381_v19 = vsel %vm64_vm1, %v380_v1, 0.0 }
 0x1c0   :  { %v371_v20 = vadd.f32 %v370_v17, %v369_v24  ;;  %v382_v21 = vrot.slane %v381_v19, 4 }
 0x1c2   :  { %v372_v22 = vrot.slane %v371_v20, 2  ;;  %v383_v5 = vadd.f32 %v382_v21, %v381_v19 }
 0x1c4   :  { %v373_v2 = vadd.f32 %v372_v22, %v371_v20  ;;  %v384_v7 = vrot.slane %v383_v5, 2 }
 0x1c6   :  { %v374_v4 = vrot.slane %v373_v2, 1  ;;  %v385_v23 = vadd.f32 %v384_v7, %v383_v5 }
 0x1c8   :  { %v375_v27 = vadd.f32 %v374_v4, %v373_v2  ;;  %v386_v28 = vrot.slane %v385_v23, 1 }
 0x1ca   :  { %v387_v12 = vadd.f32 %v386_v28, %v385_v23  ;;  %389 = vst.msk [vmem:[%s660_s7] sm:$0x1] %vm388_vm2, %v375_v27 }
 0x1cc   :  { %390 = vst.msk [vmem:[%s660_s7 + $0x1] sm:$0x1] %vm388_vm2, %v387_v12 }
 0x1cd   :  { %399 = vsyncpa [#allocation3], 1 }

</bundles_post_ra>
